<compile_context>
chip_gen: v6e
topology: v6e:2x2x1
jax: 0.10.0
libtpu: 0.0.40
codegen_flags: <defaults>
</compile_context>

<pallas_src>
import functools

import jax
import jax.numpy as jnp
from jax.experimental import pallas as pl
from jax.experimental.pallas import tpu as pltpu


def _round_up(n: int, m: int) -> int:
    return ((n + m - 1) // m) * m


def _layernorm_kernel(x_ref, a_ref, b_ref, o_ref, *, eps: float, inv_denom: float):
    # x_ref: (TS, D) row tile; a_ref/b_ref: (1, D) resident parameter rows.
    x = x_ref[...].astype(jnp.float32)                               # stats in f32
    mean = jnp.mean(x, axis=-1, keepdims=True)                       # (TS, 1)
    diff = x - mean                                                  # (TS, D)
    var = jnp.sum(diff * diff, axis=-1, keepdims=True) * inv_denom   # unbiased (D-1)
    std = jnp.sqrt(var)                                              # (TS, 1)
    # Column reciprocal on the EUP slot instead of a full-tile VALU divide.
    inv = pl.reciprocal(std + eps, approx=True)                      # (TS, 1)
    y = a_ref[...].astype(jnp.float32) * diff * inv + b_ref[...].astype(jnp.float32)
    o_ref[...] = y.astype(o_ref.dtype)


def _vmem_capacity_bytes() -> int:
    try:
        return int(pltpu.get_tpu_info().vmem_capacity_bytes)
    except Exception:
        # Conservative default (v7x-sized per-TC VMEM) if the query is unavailable.
        return 64 * 1024 * 1024


def _pick_tiling(N: int, D: int, itemsize: int):
    """Return (row-tile TS, vmem_limit_bytes) sized per TPU generation."""
    vmem_cap = _vmem_capacity_bytes()
    small_vmem = vmem_cap <= 64 * 1024 * 1024          # v7x-class
    block_budget = (4 if small_vmem else 8) * 1024 * 1024

    # Sublane packing: f32 -> 8 rows/vreg, bf16 -> 16, int8 -> 32.
    row_align = max(8, 32 // max(itemsize, 1))

    ts = (block_budget // max(D * itemsize, 1)) // row_align * row_align
    ts = max(ts, row_align)
    # Never larger than the (aligned) problem itself.
    ts = min(ts, _round_up(N, row_align))
    # Keep the parallel grid axis >= 2 steps when N allows it (v7x: 2 TCs).
    if N >= 2 * row_align:
        half = _round_up(-(-N // 2), row_align)
        ts = min(ts, half)
    ts = max(ts, row_align)

    # Scoped-VMEM request: double-buffered in + out blocks + params + slack.
    block_bytes = ts * D * itemsize
    footprint = 4 * block_bytes + 4 * 2 * D * max(itemsize, 4) + (4 << 20)
    cap = (48 if small_vmem else 72) * 1024 * 1024     # leave headroom on v7x
    vmem_limit = min(cap, max(16 * 1024 * 1024, _round_up(footprint, 1 << 20)))
    return ts, vmem_limit


def layer_norm(x: jnp.ndarray,
               a: jnp.ndarray,
               b: jnp.ndarray,
               eps: float = 1e-6) -> jnp.ndarray:
    """x: (..., D); a, b: (D,).  Returns same shape/dtype as x."""
    orig_shape = x.shape
    D = orig_shape[-1]
    x2 = x.reshape(-1, D)
    N = x2.shape[0]

    TS, vmem_limit = _pick_tiling(N, D, x2.dtype.itemsize)

    a2 = a.reshape(1, D)
    b2 = b.reshape(1, D)

    # torch.std is unbiased (divides by D-1); guard the degenerate D==1 case
    # (intentional deviation: torch would produce NaN there).
    inv_denom = 1.0 / float(max(D - 1, 1))

    kernel = functools.partial(_layernorm_kernel, eps=float(eps), inv_denom=inv_denom)

    out = pl.pallas_call(
        kernel,
        out_shape=jax.ShapeDtypeStruct((N, D), x.dtype),
        grid=(pl.cdiv(N, TS),),                         # partial last block is masked
        in_specs=[
            pl.BlockSpec((TS, D), lambda i: (i, 0)),    # x row-tile
            pl.BlockSpec((1, D), lambda i: (0, 0)),     # a (resident across grid)
            pl.BlockSpec((1, D), lambda i: (0, 0)),     # b (resident across grid)
        ],
        out_specs=pl.BlockSpec((TS, D), lambda i: (i, 0)),
        compiler_params=pltpu.CompilerParams(
            dimension_semantics=("parallel",),
            vmem_limit_bytes=int(vmem_limit),
        ),
    )(x2, a2, b2)

    return out.reshape(orig_shape)


if __name__ == "__main__":
    # Small shapes implied by the transformer module: batch=2, seq=8, hidden=32.
    B, S, D = 2, 8, 32
    EPS = 1e-6

    key = jax.random.PRNGKey(0)
    kx, ka, kb = jax.random.split(key, 3)
    x = jax.random.normal(kx, (B, S, D), dtype=jnp.float32)
    # Learnable params (module init is ones/zeros; perturb to make the test
    # non-trivial while staying deterministic).
    a = 1.0 + 0.1 * jax.random.normal(ka, (D,), dtype=jnp.float32)
    b = 0.1 * jax.random.normal(kb, (D,), dtype=jnp.float32)

    out = layer_norm(x, a, b, eps=EPS)
    out = jax.block_until_ready(out)

    # Pure-JAX reference matching PyTorch semantics (unbiased std, std + eps).
    mean = jnp.mean(x, axis=-1, keepdims=True)
    std = jnp.sqrt(jnp.sum((x - mean) ** 2, axis=-1, keepdims=True) / (D - 1))
    ref = a * (x - mean) / (std + EPS) + b

    assert out.shape == x.shape
    # Tolerance accounts for the EUP approximate reciprocal (~1e-4 relative).
    assert jnp.allclose(out, ref, atol=5e-3, rtol=5e-3), "mismatch vs reference"

    print("KERNEL_OK")
</pallas_src>

<mosaic_0001>
module attributes {stable_mosaic.version = 11 : i64} {
  func.func @_layernorm_kernel(%arg0: i32, %arg1: memref<8x32xf32, #tpu.memory_space<vmem>>, %arg2: memref<1x32xf32, #tpu.memory_space<vmem>>, %arg3: memref<1x32xf32, #tpu.memory_space<vmem>>, %arg4: memref<8x32xf32, #tpu.memory_space<vmem>>) attributes {dimension_semantics = [#tpu.dimension_semantics<parallel>], iteration_bounds = array<i64: 2>, scalar_prefetch = 0 : i64, scratch_operands = 0 : i64, tpu.core_type = #tpu.core_type<tc>, window_params = [{transform_indices = @transform_0, window_bounds = array<i64: 8, 32>}, {pipeline_mode = #tpu.pipeline_mode<synchronous>, transform_indices = @transform_1, window_bounds = array<i64: 1, 32>}, {pipeline_mode = #tpu.pipeline_mode<synchronous>, transform_indices = @transform_2, window_bounds = array<i64: 1, 32>}, {transform_indices = @transform_3, window_bounds = array<i64: 8, 32>}]} {
    %c0 = arith.constant 0 : index
    %c0_0 = arith.constant 0 : index
    %0 = vector.load %arg1[%c0, %c0_0] : memref<8x32xf32, #tpu.memory_space<vmem>>, vector<8x32xf32>
    %cst = arith.constant dense<0.000000e+00> : vector<8xf32>
    %1 = vector.multi_reduction <add>, %0, %cst [1] : vector<8x32xf32> to vector<8xf32>
    %2 = vector.shape_cast %1 : vector<8xf32> to vector<8x1xf32>
    %cst_1 = arith.constant 3.200000e+01 : f32
    %3 = vector.broadcast %cst_1 : f32 to vector<8x1xf32>
    %4 = arith.divf %2, %3 : vector<8x1xf32>
    %5 = vector.broadcast %4 : vector<8x1xf32> to vector<8x32xf32>
    %6 = arith.subf %0, %5 : vector<8x32xf32>
    %7 = arith.mulf %6, %6 : vector<8x32xf32>
    %cst_2 = arith.constant dense<0.000000e+00> : vector<8xf32>
    %8 = vector.multi_reduction <add>, %7, %cst_2 [1] : vector<8x32xf32> to vector<8xf32>
    %9 = vector.shape_cast %8 : vector<8xf32> to vector<8x1xf32>
    %cst_3 = arith.constant 0.0322580636 : f32
    %10 = vector.broadcast %cst_3 : f32 to vector<8x1xf32>
    %11 = arith.mulf %9, %10 : vector<8x1xf32>
    %12 = math.sqrt %11 : vector<8x1xf32>
    %cst_4 = arith.constant 9.99999997E-7 : f32
    %13 = vector.broadcast %cst_4 : f32 to vector<8x1xf32>
    %14 = arith.addf %12, %13 : vector<8x1xf32>
    %15 = tpu.reciprocal %14 {approx = true} : vector<8x1xf32> -> vector<8x1xf32>
    %c0_5 = arith.constant 0 : index
    %c0_6 = arith.constant 0 : index
    %16 = vector.load %arg2[%c0_5, %c0_6] : memref<1x32xf32, #tpu.memory_space<vmem>>, vector<1x32xf32>
    %17 = vector.broadcast %16 : vector<1x32xf32> to vector<8x32xf32>
    %18 = arith.mulf %17, %6 : vector<8x32xf32>
    %19 = vector.broadcast %15 : vector<8x1xf32> to vector<8x32xf32>
    %20 = arith.mulf %18, %19 : vector<8x32xf32>
    %c0_7 = arith.constant 0 : index
    %c0_8 = arith.constant 0 : index
    %21 = vector.load %arg3[%c0_7, %c0_8] : memref<1x32xf32, #tpu.memory_space<vmem>>, vector<1x32xf32>
    %22 = vector.broadcast %21 : vector<1x32xf32> to vector<8x32xf32>
    %23 = arith.addf %20, %22 : vector<8x32xf32>
    %c0_9 = arith.constant 0 : index
    %c0_10 = arith.constant 0 : index
    %24 = vector.load %arg4[%c0_9, %c0_10] : memref<8x32xf32, #tpu.memory_space<vmem>>, vector<8x32xf32>
    tpu.vector_store %arg4[%c0_9, %c0_10], %23 {strides = array<i32>} : memref<8x32xf32, #tpu.memory_space<vmem>>, vector<8x32xf32>,
    return
  }
  func.func @transform_0(%arg0: i32) -> (i32, i32) {
    %c0_i32 = arith.constant 0 : i32
    %c0_i32_0 = arith.constant 0 : i32
    return %arg0, %c0_i32 : i32, i32
  }
  func.func @transform_1(%arg0: i32) -> (i32, i32) {
    %c0_i32 = arith.constant 0 : i32
    %c0_i32_0 = arith.constant 0 : i32
    %c0_i32_1 = arith.constant 0 : i32
    return %c0_i32, %c0_i32_0 : i32, i32
  }
  func.func @transform_2(%arg0: i32) -> (i32, i32) {
    %c0_i32 = arith.constant 0 : i32
    %c0_i32_0 = arith.constant 0 : i32
    %c0_i32_1 = arith.constant 0 : i32
    return %c0_i32, %c0_i32_0 : i32, i32
  }
  func.func @transform_3(%arg0: i32) -> (i32, i32) {
    %c0_i32 = arith.constant 0 : i32
    %c0_i32_0 = arith.constant 0 : i32
    return %arg0, %c0_i32 : i32, i32
  }
}

</mosaic_0001>

<bundles_post_ra>
// kernel: tpu_custom_call.1
= control target key start
LH: loop header
LB: loop body
LE: loop exit
PB: predicated region body
PF: predicated region fallthrough
CT: control target
= control target key end

     0   :  { %8 = vsyncpa [#allocation3], 0  ;;  %s644_s0 = inlined_call_operand.hbm [shape: f32[16,32], index: 0, kind: input, shape index: {}]   ;;  %s645_s1 = inlined_call_operand.vmem [shape: f32[1,32], index: 1, kind: input, shape index: {}]   ;;  %s646_s2 = inlined_call_operand.vmem [shape: f32[1,32], index: 2, kind: input, shape index: {}]   ;;  %s647_s3 = inlined_call_operand.hbm [shape: f32[16,32], index: 3, kind: output, shape index: {}]  }
   0x1   :  { %10 = vsyncpa [#allocation3 + $0x1], 0 }
   0x2   :  { %11 = vsyncpa [#allocation4], 0 }
   0x3   :  { %13 = vsyncpa [#allocation4 + $0x1], 0  ;;  %s490_s12 = smov 0   ;;  %s492_s13 = smov 0  }
   0x4   :  { %s494_s14 = smov 0   ;;  %s496_s15 = smov 0  }
   0x5 LB: > { %s511_s16 = sadd.s32 4294967295, %s466_s15   ;;  %s310_s17 = sadd.s32 4294967294, %s466_s15   ;;  %s466_s15 = sphi %s496_s15, %s664_s15   ;;  %s462_s14 = sphi %s494_s14, %s663_s14   ;;  %s458_s13 = sphi %s492_s13, %s662_s13   ;;  %s454_s12 = sphi %s490_s12, %s661_s12  }
   0x6   : > { %s515_s18 = sadd.s32 1, %s466_s15   ;;  %s26_s19 = sadd.s32 1, %s462_s14 }
   0x7   : > { %s23_s20 = ssub.s32 %s466_s15, %s515_s18  ;;  %p33_p0 = scmp.ne.s32.totalorder %s462_s14, %s458_s13 }
   0x8   : > { %p24_p1 = scmp.eq.s32.totalorder %s23_s20, 0  ;;  %p34_p2 = scmp.eq.s32.totalorder %s466_s15, 0 }
   0x9   : > { %p39_p3 = scmp.ne.s32.totalorder %s458_s13, %s454_s12  ;;  %p40_p4 = scmp.eq.s32.totalorder %s511_s16, 0 }
   0xa   : > { %s527_s21 = scalar_select %p24_p1, %s462_s14, %s26_s19  }
   0xb   : > { %p529_p5 = por %p34_p2, %p33_p0  ;;  %p533_p6 = por %p40_p4, %p39_p3 }
   0xc   : > { %p105_p7 = scmp.eq.s32.totalorder %s511_s16, 1  ;;  %p111_p8 = scmp.eq.s32.totalorder %s310_s17, 1 }
   0xd   : > { %s651_s23 = scalar_select %p533_p6, 1, 0 }
   0xe   : > { %p336_p10 = scmp.lt.s32.totalorder %s466_s15, 2  ;;  %p540_p11 = por %p105_p7, %p33_p0 }
   0xf   : > { %p544_p12 = por %p111_p8, %p39_p3  ;;  %s137_s26 = sand.u32 1, %s462_s14  }
  0x10   : > { %s652_s24 = scalar_select %p540_p11, 1, 0 }
  0x11   : > { %s653_s25 = scalar_select %p544_p12, 1, 0 }
  0x12   : > { %s314_s27 = sshll.u32 %s466_s15, 7  ;;  %s313_s28 = sshll.u32 %s137_s26, 3 }
  0x13   : > { %s553_s4 = scalar_lea.hbm %s644_s0, %s314_s27  ;;  %s141_s5 = scalar_lea.vmem [#allocation2], %s313_s28 }
  0x14   : > { %s148_s6 = sshll.u32 %s141_s5, 4  ;;  %p557_p13 = pnand %p336_p10, %p529_p5  ;;  %s561_s6 = int_to_ptr.vmem [resolvable:$true] %s148_s6 }
  0x15   : > { %s138_s8 = scalar_lea.sflag [#allocation3], %s137_s26  ;;  %s374_s9 = scalar_lea.hbm %s553_s4, 128 }
  0x16   : > { %p375_p2 = scmp.ne.s32.totalorder %s553_s4, %s374_s9  ;;  %p376_p3 = pneg %p557_p13 }
  0x17   : > { %s379_s17 = scalar_lea.hbm %s644_s0, 256  ;;  %p380_p5 = scmp.lt.s32.totalorder %s553_s4, %s644_s0 }
  0x18   : > { %p377_p4 = pnand %p376_p3, %p375_p2  ;;  %p381_p8 = scmp.lt.s32.totalorder %s379_s17, %s374_s9 }
  0x1a   : > { %p378_p7 = pneg %p377_p4  ;;  %p382_p10 = por %p381_p8, %p380_p5 }
  0x1c   : > { %p383_p9 = pnand %p382_p10, %p378_p7 }
  0x1e   : > { %386 = shalt.err (!%p383_p9)
}
  0x1f   : > { %s387_s22 = scalar_lea.vmem %s561_s6, 128  ;;  %s468_s26 = smov [#allocation2]  }
  0x20   : > { %p388_p0 = scmp.ne.s32.totalorder %s561_s6, %s387_s22  ;;  %s392_s27 = sshll.u32 %s468_s26, 4  ;;  %s393_s27 = int_to_ptr.vmem [resolvable:$false] %s392_s27 }
  0x21   : > { %s394_s28 = scalar_lea.vmem %s393_s27, 256  ;;  %p395_p4 = scmp.lt.s32.totalorder %s561_s6, %s393_s27 }
  0x22   : > { %p390_p1 = pnand %p388_p0, %p376_p3  ;;  %p396_p12 = scmp.lt.s32.totalorder %s394_s28, %s387_s22 }
  0x24   : > { %p391_p2 = pneg %p390_p1  ;;  %p397_p11 = por %p396_p12, %p395_p4 }
  0x26   : > { %p398_p6 = pnand %p397_p11, %p391_p2 }
  0x28   : > { %401 = shalt.err (!%p398_p6)
}
  0x29   : > { %331 = dma.hbm_to_vmem [thread:$0]  (!%p557_p13), %s553_s4, 128, %s561_s6, %s138_s8  }
  0x2a   : > { %p655_p9 = scmp.lt.s32.totalorder %s466_s15, 3  ;;  %p656_p7 = scmp.ge.s32.totalorder %s466_s15, 1 }
  0x2c   : > { %p154_p0 = pnand %p656_p7, %p655_p9 }
  0x2d   : > { %s588_s29 = sand.u32 (!%p154_p0), 1, %s458_s13   ;;  %p657_p6 = scmp.ne.s32.totalorder (!%p154_p0), %s651_s23, 0 }
  0x2e   : > { %157 = sbr.rel (%p154_p0) target bundleno = 390 (0x186), region = 32  ;;  %s316_s30 = sshll.u32 (!%p154_p0), %s588_s29, 3 }
  0x2f   : > { %s160_s5 = scalar_lea.sflag (!%p154_p0), [#allocation3], %s588_s29  ;;  %s163_s7 = scalar_lea.vmem (!%p154_p0), [#allocation2], %s316_s30 }
  0x33   : > { %445 = dma.done.wait (%p657_p6), %s160_s5, 128  }
  0x34   : > { %447 = vsyncadd (%p657_p6), %s160_s5, 4294967168  ;;  %vm187_vm0 = vcmask 261120   ;;  %v186_v0 = vld [vmem:[%s163_s7] sm:$0xff]  ;;  %s321_s9 = sshll.u32 %s511_s16, 7  ;;  %s185_s10 = scalar_lea.vmem [#allocation5], %s316_s30 }
  0x35   : > { %v188_v1 = vsel %vm187_vm0, %v186_v0, 0.0  ;;  %v318_v15 = vld [vmem:[%s645_s1] ss:$0 sm:$0xff]  ;;  %s240_s11 = sshll.u32 %s185_s10, 4  ;;  %s238_s20 = scalar_lea.hbm %s647_s3, %s321_s9  ;;  %s241_s11 = int_to_ptr.vmem [resolvable:$true] %s240_s11 }
  0x36   : > { %189 = vadd.xlane.f32.xlu0 %v188_v1  ;;  %v319_v18 = vld [vmem:[%s646_s2] ss:$0 sm:$0xff]  ;;  %s227_s22 = scalar_lea.sflag [#allocation4], %s588_s29  ;;  %s402_s26 = scalar_lea.vmem %s241_s11, 128 }
  0x37   : > { %p403_p11 = scmp.ne.s32.totalorder %s241_s11, %s402_s26  ;;  %p658_p12 = scmp.ne.s32.totalorder %s652_s24, 0 }
  0x38   : > { %s469_s27 = smov [#allocation5]  }
  0x39   : > { %p404_p13 = pnand %p403_p11, %p658_p12  ;;  %s406_s16 = sshll.u32 %s469_s27, 4  ;;  %s407_s16 = int_to_ptr.vmem [resolvable:$false] %s406_s16 }
  0x3a   : > { %s408_s28 = scalar_lea.vmem %s407_s16, 256  ;;  %p409_p3 = scmp.lt.s32.totalorder %s241_s11, %s407_s16 }
  0x3b   : > { %p405_p1 = pneg %p404_p13  ;;  %p410_p5 = scmp.lt.s32.totalorder %s408_s28, %s402_s26 }
  0x3d   : > { %p411_p8 = por %p410_p5, %p409_p3 }
  0x3f   : > { %p412_p10 = pnand %p411_p8, %p405_p1 }
  0xbf   : > { %v190_v2 = vpop.xlane.xlu0 %189 }
  0xc0   : > { %v192_v3 = vmul.f32 0.03125, %v190_v2 }
  0xc2   : > { %v193_v4 = vsub.f32 %v186_v0, %v192_v3 }
  0xc4   : > { %v194_v5 = vmul.f32 %v193_v4, %v193_v4  ;;  %v215_v16 = vmul.f32 %v318_v15, %v193_v4 }
  0xc6   : > { %v195_v6 = vsel %vm187_vm0, %v194_v5, 0.0 }
  0xc7   : > { %196 = vadd.xlane.f32.xlu0 %v195_v6 }
 0x150   : > { %v197_v7 = vpop.xlane.xlu0 %196 }
 0x151   : > { %v198_v8 = vmul.f32 0.032258064, %v197_v7 }
 0x153   : > { %370 = vrsqrt.f32 %v198_v8  ;;  %vm201_vm1 = vcmp.eq.f32.partialorder %v198_v8, inf  ;;  %v204_v11 = vand.u32 2147483648, %v198_v8  ;;  %vm203_vm2 = vcmp.eq.f32.partialorder %v198_v8, 0.0 }
 0x160   : > { %v371_v9 = vpop.eup %370 }
 0x161   : > { %v200_v10 = vmul.f32 %v371_v9, %v198_v8 }
 0x163   : > { %v202_v12 = vsel %vm201_vm1, %v198_v8, %v200_v10 }
 0x164   : > { %v205_v13 = vsel %vm203_vm2, %v204_v11, %v202_v12 }
 0x165   : > { %v206_v14 = vadd.f32 1e-06, %v205_v13 }
 0x167   : > { %372 = vrcp.f32 %v206_v14 }
 0x174   : > { %v373_v17 = vpop.eup %372 }
 0x175   : > { %v216_v19 = vmul.f32 %v373_v17, %v215_v16 }
 0x177   : > { %v224_v20 = vadd.f32 %v319_v18, %v216_v19 }
 0x179   : > { %225 = vst.msk [vmem:[%s185_s10] sm:$0xff] %vm187_vm0, %v224_v20 }
 0x17a   : > { %415 = shalt.err (!%p412_p10)
}
 0x17b   : > { %s416_s30 = scalar_lea.hbm %s238_s20, 128  ;;  %s420_s7 = scalar_lea.hbm %s647_s3, 256 }
 0x17c   : > { %p417_p2 = scmp.ne.s32.totalorder %s238_s20, %s416_s30  ;;  %p421_p7 = scmp.lt.s32.totalorder %s238_s20, %s647_s3 }
 0x17d   : > { %p422_p0 = scmp.lt.s32.totalorder %s420_s7, %s416_s30 }
 0x17e   : > { %p418_p4 = pnand %p417_p2, %p658_p12 }
 0x17f   : > { %p423_p6 = por %p422_p0, %p421_p7 }
 0x180   : > { %p419_p9 = pneg %p418_p4 }
 0x182   : > { %p424_p11 = pnand %p423_p6, %p419_p9 }
 0x184   : > { %427 = shalt.err (!%p424_p11)
}
 0x185   : > { %326 = dma.vmem_to_hbm [thread:$0]  (%p658_p12), %s241_s11, 128, %s238_s20, %s227_s22  }
 0x186 PF: > { %s252_s6 = sand.u32 1, %s454_s12   ;;  %p659_p13 = scmp.ne.s32.totalorder %s653_s25, 0 }
 0x187   : > { %p660_p1 = scmp.ge.s32.totalorder %s466_s15, 2  ;;  %s253_s8 = scalar_lea.sflag [#allocation4], %s252_s6 }
 0x189   : > { %p333_p3 = pnand %p660_p1, %p659_p13 }
 0x18b   : > { %p334_p5 = pneg %p333_p3 }
 0x18d   : > { %449 = dma.done.wait (%p334_p5), %s253_s8, 128  }
 0x18e   : > { %451 = vsyncadd (%p334_p5), %s253_s8, 4294967168  ;;  %p16_p8 = scmp.ge.s32.totalorder %s515_s18, 4   ;;  %s661_s12 = smov %s458_s13 }
 0x18f   : > { %s662_s13 = smov %s462_s14  ;;  %s663_s14 = smov %s527_s21 }
 0x190   : > { %s664_s15 = smov %s515_s18  ;;  %18 = sbr.rel (!%p16_p8) target bundleno = 5 (0x5), region = 77 }
 0x195   :  { %258 = vsyncpa [#allocation3], 1 }
 0x196   :  { %260 = vsyncpa [#allocation3 + $0x1], 1 }
 0x197   :  { %261 = vsyncpa [#allocation4], 1 }
 0x198   :  { %263 = vsyncpa [#allocation4 + $0x1], 1 }

</bundles_post_ra>
